<compile_context>
chip_gen: v5e
topology: v5e:2x2
jax: 0.10.0
libtpu: 0.0.40
codegen_flags: <defaults>
</compile_context>

<pallas_src>
import functools

import jax
import jax.numpy as jnp
from jax.experimental import pallas as pl
from jax.experimental.pallas import tpu as pltpu

K_IN = 1936                     # input feature dim of the STTran heads
N_A, N_S, N_C = 3, 6, 17
N_OUT = N_A + N_S + N_C         # 26 logical output columns
OUT_PAD = 128                   # lane-dense padded output width
ROW_TILE = 512                  # large row tile amortizes per-step overhead
ROW_ALIGN = 8                   # sublane alignment for the row block


def _round_up(v, m):
    return ((v + m - 1) // m) * m


def _sttran_kernel(x_ref, w_ref, b_ref, o_ref):
    # One fused MXU pass for all three heads: bf16 feed, f32 accumulation.
    x_bf = x_ref[...].astype(jnp.bfloat16)
    y = jnp.dot(x_bf, w_ref[...], preferred_element_type=jnp.float32)
    y = y + b_ref[...]
    # Columns [N_A, N_OUT) (spatial + contacting heads) get a sigmoid;
    # attention columns pass through as raw logits.  Mask is a trace-time
    # constant iota/compare -- no extra input, cheap VPU work.
    col = jax.lax.broadcasted_iota(jnp.int32, (1, OUT_PAD), 1)
    apply_sig = (col >= N_A) & (col < N_OUT)
    o_ref[...] = jnp.where(apply_sig, jax.nn.sigmoid(y), y)


@functools.partial(jax.jit, static_argnames=("row_tile",))
def _sttran_call(x, w_bf, b_packed, *, row_tile):
    n = x.shape[0]
    grid = (pl.cdiv(n, row_tile),)
    return pl.pallas_call(
        _sttran_kernel,
        out_shape=jax.ShapeDtypeStruct((n, OUT_PAD), jnp.float32),
        grid_spec=pltpu.PrefetchScalarGridSpec(
            num_scalar_prefetch=0,
            grid=grid,
            in_specs=[
                pl.BlockSpec((row_tile, K_IN), lambda i: (i, 0)),   # x row tile (f32)
                pl.BlockSpec((K_IN, OUT_PAD), lambda i: (0, 0)),    # packed W (resident, bf16)
                pl.BlockSpec((1, OUT_PAD), lambda i: (0, 0)),       # packed bias (f32)
            ],
            out_specs=pl.BlockSpec((row_tile, OUT_PAD), lambda i: (i, 0)),
        ),
        compiler_params=pltpu.CompilerParams(
            dimension_semantics=("parallel",),
            vmem_limit_bytes=32 * 1024 * 1024,
        ),
    )(x, w_bf, b_packed)


def sttran_forward(x, w_packed_bf, b_packed, *, row_tile=ROW_TILE):
    """x: [N, 1936] f32. Returns the STTran 'entry' dict (f32 outputs)."""
    n = x.shape[0]
    assert x.shape[1] == K_IN
    # Small batches collapse to a single grid step; large ones tile by row_tile.
    tile = _round_up(max(min(n, row_tile), 1), ROW_ALIGN)
    y = _sttran_call(x, w_packed_bf, b_packed, row_tile=tile)
    return {
        "attention_distribution": y[:, :N_A],
        "spatial_distribution": y[:, N_A:N_A + N_S],
        "contacting_distribution": y[:, N_A + N_S:N_OUT],
    }


def init_params(key):
    """Deterministic init mimicking nn.Linear (uniform +/- 1/sqrt(fan_in))."""
    bound = 1.0 / jnp.sqrt(jnp.float32(K_IN))
    ka, ks, kc, kba, kbs, kbc = jax.random.split(key, 6)
    w_a = jax.random.uniform(ka, (K_IN, N_A), jnp.float32, -bound, bound)
    w_s = jax.random.uniform(ks, (K_IN, N_S), jnp.float32, -bound, bound)
    w_c = jax.random.uniform(kc, (K_IN, N_C), jnp.float32, -bound, bound)
    b_a = jax.random.uniform(kba, (N_A,), jnp.float32, -bound, bound)
    b_s = jax.random.uniform(kbs, (N_S,), jnp.float32, -bound, bound)
    b_c = jax.random.uniform(kbc, (N_C,), jnp.float32, -bound, bound)

    w_packed = jnp.zeros((K_IN, OUT_PAD), jnp.float32)
    w_packed = w_packed.at[:, :N_A].set(w_a)
    w_packed = w_packed.at[:, N_A:N_A + N_S].set(w_s)
    w_packed = w_packed.at[:, N_A + N_S:N_OUT].set(w_c)
    w_packed_bf = w_packed.astype(jnp.bfloat16)      # resident weight in bf16

    b_packed = jnp.zeros((1, OUT_PAD), jnp.float32)
    b_packed = b_packed.at[0, :N_A].set(b_a)
    b_packed = b_packed.at[0, N_A:N_A + N_S].set(b_s)
    b_packed = b_packed.at[0, N_A + N_S:N_OUT].set(b_c)

    return w_packed_bf, b_packed, (w_a, w_s, w_c, b_a, b_s, b_c)


if __name__ == "__main__":
    # TODO(synk): the torch.isnan(input) assert is a host-side check in the
    # original module and is not replicated inside the kernel.
    key = jax.random.PRNGKey(0)
    kx, kx2, kp = jax.random.split(key, 3)
    w_packed_bf, b_packed, (w_a, w_s, w_c, b_a, b_s, b_c) = init_params(kp)

    def reference(x):
        # Same math as the kernel: bf16-quantized operands, f32 accumulation.
        xb = x.astype(jnp.bfloat16)

        def head(w, b):
            return jnp.dot(xb, w.astype(jnp.bfloat16),
                           preferred_element_type=jnp.float32) + b

        return (head(w_a, b_a),
                jax.nn.sigmoid(head(w_s, b_s)),
                jax.nn.sigmoid(head(w_c, b_c)))

    def check(entry, refs):
        ra, rs, rc = refs
        assert jnp.allclose(entry["attention_distribution"], ra, atol=1e-4, rtol=1e-4)
        assert jnp.allclose(entry["spatial_distribution"], rs, atol=1e-4, rtol=1e-4)
        assert jnp.allclose(entry["contacting_distribution"], rc, atol=1e-4, rtol=1e-4)

    # Small batch (8 relation proposals) -> single grid step path.
    x_small = jax.random.normal(kx, (8, K_IN), jnp.float32)
    entry_small = sttran_forward(x_small, w_packed_bf, b_packed)
    jax.block_until_ready(entry_small["contacting_distribution"])
    check(entry_small, reference(x_small))

    # Larger, non-multiple batch -> exercises the ragged last block + tiled grid.
    x_big = jax.random.normal(kx2, (1040, K_IN), jnp.float32)
    entry_big = sttran_forward(x_big, w_packed_bf, b_packed, row_tile=ROW_TILE)
    jax.block_until_ready(entry_big["contacting_distribution"])
    check(entry_big, reference(x_big))

    print("KERNEL_OK")
</pallas_src>

<mosaic_0001>
module attributes {stable_mosaic.version = 11 : i64} {
  func.func @_sttran_kernel(%arg0: i32, %arg1: memref<8x1936xf32, #tpu.memory_space<vmem>>, %arg2: memref<1936x128xbf16, #tpu.memory_space<vmem>>, %arg3: memref<1x128xf32, #tpu.memory_space<vmem>>, %arg4: memref<8x128xf32, #tpu.memory_space<vmem>>) attributes {dimension_semantics = [#tpu.dimension_semantics<parallel>], iteration_bounds = array<i64: 1>, scalar_prefetch = 0 : i64, scratch_operands = 0 : i64, tpu.core_type = #tpu.core_type<tc>, window_params = [{transform_indices = @transform_0, window_bounds = array<i64: 8, 1936>}, {pipeline_mode = #tpu.pipeline_mode<synchronous>, transform_indices = @transform_1, window_bounds = array<i64: 1936, 128>}, {pipeline_mode = #tpu.pipeline_mode<synchronous>, transform_indices = @transform_2, window_bounds = array<i64: 1, 128>}, {transform_indices = @transform_3, window_bounds = array<i64: 8, 128>}]} {
    %c0 = arith.constant 0 : index
    %c0_0 = arith.constant 0 : index
    %0 = vector.load %arg1[%c0, %c0_0] : memref<8x1936xf32, #tpu.memory_space<vmem>>, vector<8x1936xf32>
    %1 = arith.truncf %0 : vector<8x1936xf32> to vector<8x1936xbf16>
    %c0_1 = arith.constant 0 : index
    %c0_2 = arith.constant 0 : index
    %2 = vector.load %arg2[%c0_1, %c0_2] : memref<1936x128xbf16, #tpu.memory_space<vmem>>, vector<1936x128xbf16>
    %cst = arith.constant dense<0.000000e+00> : vector<8x128xf32>
    %3 = tpu.matmul %1, %2, %cst {dimension_numbers = #tpu.dot_dimension_numbers<[1], [0], [0], [1], [0, 0, 1, 1], [], []>} : vector<8x1936xbf16>, vector<1936x128xbf16>, vector<8x128xf32> -> vector<8x128xf32>
    %c0_3 = arith.constant 0 : index
    %c0_4 = arith.constant 0 : index
    %4 = vector.load %arg3[%c0_3, %c0_4] : memref<1x128xf32, #tpu.memory_space<vmem>>, vector<1x128xf32>
    %5 = vector.broadcast %4 : vector<1x128xf32> to vector<8x128xf32>
    %6 = arith.addf %3, %5 : vector<8x128xf32>
    %7 = tpu.iota {dimensions = array<i32: 1>} : vector<1x128xi32>
    %c3_i32 = arith.constant 3 : i32
    %8 = vector.broadcast %c3_i32 : i32 to vector<1x128xi32>
    %9 = arith.cmpi sge, %7, %8 : vector<1x128xi32>
    %c26_i32 = arith.constant 26 : i32
    %10 = vector.broadcast %c26_i32 : i32 to vector<1x128xi32>
    %11 = arith.cmpi slt, %7, %10 : vector<1x128xi32>
    %12 = arith.andi %9, %11 : vector<1x128xi1>
    %13 = arith.negf %6 : vector<8x128xf32>
    %14 = math.exp %13 : vector<8x128xf32>
    %cst_5 = arith.constant 1.000000e+00 : f32
    %15 = vector.broadcast %cst_5 : f32 to vector<8x128xf32>
    %16 = arith.addf %15, %14 : vector<8x128xf32>
    %17 = arith.divf %15, %16 : vector<8x128xf32>
    %18 = vector.shape_cast %12 : vector<1x128xi1> to vector<1x128xi1>
    %19 = vector.broadcast %18 : vector<1x128xi1> to vector<8x128xi1>
    %20 = arith.select %19, %17, %6 : vector<8x128xi1>, vector<8x128xf32>
    %c0_6 = arith.constant 0 : index
    %c0_7 = arith.constant 0 : index
    %21 = vector.load %arg4[%c0_6, %c0_7] : memref<8x128xf32, #tpu.memory_space<vmem>>, vector<8x128xf32>
    tpu.vector_store %arg4[%c0_6, %c0_7], %20 {strides = array<i32>} : memref<8x128xf32, #tpu.memory_space<vmem>>, vector<8x128xf32>,
    return
  }
  func.func @transform_0(%arg0: i32) -> (i32, i32) {
    %c0_i32 = arith.constant 0 : i32
    %c0_i32_0 = arith.constant 0 : i32
    return %arg0, %c0_i32 : i32, i32
  }
  func.func @transform_1(%arg0: i32) -> (i32, i32) {
    %c0_i32 = arith.constant 0 : i32
    %c0_i32_0 = arith.constant 0 : i32
    %c0_i32_1 = arith.constant 0 : i32
    return %c0_i32, %c0_i32_0 : i32, i32
  }
  func.func @transform_2(%arg0: i32) -> (i32, i32) {
    %c0_i32 = arith.constant 0 : i32
    %c0_i32_0 = arith.constant 0 : i32
    %c0_i32_1 = arith.constant 0 : i32
    return %c0_i32, %c0_i32_0 : i32, i32
  }
  func.func @transform_3(%arg0: i32) -> (i32, i32) {
    %c0_i32 = arith.constant 0 : i32
    %c0_i32_0 = arith.constant 0 : i32
    return %arg0, %c0_i32 : i32, i32
  }
}

</mosaic_0001>

<bundles_post_ra>
// kernel: _sttran_call.1
= control target key start
LH: loop header
LB: loop body
LE: loop exit
PB: predicated region body
PF: predicated region fallthrough
CT: control target
= control target key end

     0   :  { %8 = vsyncpa [#allocation3], 0  ;;  %s2040_s0 = inlined_call_operand.hbm [shape: f32[8,1936], index: 0, kind: input, shape index: {}]   ;;  %s2041_s1 = inlined_call_operand.hbm [shape: bf16[1936,128], index: 1, kind: input, shape index: {}]   ;;  %s2042_s2 = inlined_call_operand.vmem [shape: f32[1,128], index: 2, kind: input, shape index: {}]   ;;  %s2043_s3 = inlined_call_operand.hbm [shape: f32[8,128], index: 3, kind: output, shape index: {}]  }
   0x1   :  { %9 = vsyncpa [#allocation6], 0 }
   0x2   :  { %10 = vsyncpa [#allocation4], 0  ;;  %s16_s14 = sshll.u32 %s2040_s0, 4  ;;  %s2003_s15 = smov [#allocation2]   ;;  %s17_s14 = int_to_ptr.hbm [resolvable:$true] %s16_s14 }
   0x3   :  { %s18_s16 = sshll.u32 %s2003_s15, 4  ;;  %s26_s19 = sshll.u32 %s2041_s1, 4  ;;  %s19_s16 = int_to_ptr.vmem [resolvable:$true] %s18_s16  ;;  %s27_s19 = int_to_ptr.hbm [resolvable:$true] %s26_s19 }
   0x4   :  { %21 = dma.hbm_to_vmem [thread:$0]  %s17_s14, 2048, %s19_s16, [#allocation3]  }
   0x5   :  { %s2004_s20 = smov [#allocation5]   ;;  %s2005_s22 = smov 64  }
   0x6   :  { %s28_s21 = sshll.u32 %s2004_s20, 4  ;;  %s2006_s23 = smov 4   ;;  %s29_s21 = int_to_ptr.vmem [resolvable:$true] %s28_s21 }
   0x7   :  { %34 = dma.hbm_to_vmem [thread:$0]  %s27_s19, 15488, %s29_s21, [#allocation6], %s2005_s22, %s2005_s22, %s2006_s23  }
   0x8   :  { %1997 = dma.done.wait [#allocation3], 2048  }
   0x9   :  { %1998 = vsyncadd [#allocation3], 4294965248 }
   0xa   :  { %1999 = dma.done.wait [#allocation6], 15488  }
   0xb   :  { %2000 = vsyncadd [#allocation6], 4294951808  ;;  %v1801_v0 = vld [vmem:[#allocation5 + $0x38] sm:$0xff]  ;;  %v1800_v4 = vld [vmem:[#allocation5 + $0x30] sm:$0xff]  ;;  %vm1050_vm0 = vcmask 130048   ;;  %s1297_s27 = sshll.u32 %s2043_s3, 4  ;;  %s1298_s27 = int_to_ptr.hbm [resolvable:$true] %s1297_s27 }
   0xc   :  { %v1809_v1 = vld [vmem:[#allocation5 + $0x78] sm:$0xff]  ;;  %1054 = vmatpush.bf16.msra.mxu0 %v1801_v0  ;;  %v1808_v5 = vld [vmem:[#allocation5 + $0x70] sm:$0xff]  ;;  %v1799_v8 = vld [vmem:[#allocation5 + $0x28] sm:$0xff] }
   0xd   :  { %v1817_v2 = vld [vmem:[#allocation5 + $0xb8] sm:$0xff]  ;;  %1067 = vmatpush.bf16.msra.mxu1 %v1809_v1  ;;  %v1816_v6 = vld [vmem:[#allocation5 + $0xb0] sm:$0xff]  ;;  %v1807_v9 = vld [vmem:[#allocation5 + $0x68] sm:$0xff] }
   0xe   :  { %v1825_v3 = vld [vmem:[#allocation5 + $0xf8] sm:$0xff]  ;;  %1080 = vmatpush.bf16.msra.mxu2 %v1817_v2  ;;  %v1824_v7 = vld [vmem:[#allocation5 + $0xf0] sm:$0xff]  ;;  %v1815_v10 = vld [vmem:[#allocation5 + $0xa8] sm:$0xff] }
   0xf   :  { %1093 = vmatpush.bf16.msra.mxu3 %v1825_v3  ;;  %v1823_v11 = vld [vmem:[#allocation5 + $0xe8] sm:$0xff]  ;;  %v1798_v12 = vld [vmem:[#allocation5 + $0x20] sm:$0xff]  ;;  %v1797_v16 = vld [vmem:[#allocation5 + $0x18] sm:$0xff] }
  0x10   :  { %1055 = vmatpush.bf16.msra.mxu0 %v1800_v4  ;;  %v1806_v13 = vld [vmem:[#allocation5 + $0x60] sm:$0xff]  ;;  %v1805_v17 = vld [vmem:[#allocation5 + $0x58] sm:$0xff]  ;;  %v1796_v20 = vld [vmem:[#allocation5 + $0x10] sm:$0xff] }
  0x11   :  { %1068 = vmatpush.bf16.msra.mxu1 %v1808_v5  ;;  %v1814_v14 = vld [vmem:[#allocation5 + $0xa0] sm:$0xff]  ;;  %v1813_v18 = vld [vmem:[#allocation5 + $0x98] sm:$0xff]  ;;  %v1804_v21 = vld [vmem:[#allocation5 + $0x50] sm:$0xff] }
  0x12   :  { %1081 = vmatpush.bf16.msra.mxu2 %v1816_v6  ;;  %v1822_v15 = vld [vmem:[#allocation5 + $0xe0] sm:$0xff]  ;;  %v1821_v19 = vld [vmem:[#allocation5 + $0xd8] sm:$0xff]  ;;  %v1812_v22 = vld [vmem:[#allocation5 + $0x90] sm:$0xff] }
  0x13   :  { %1094 = vmatpush.bf16.msra.mxu3 %v1824_v7  ;;  %v1820_v23 = vld [vmem:[#allocation5 + $0xd0] sm:$0xff]  ;;  %v1795_v24 = vld [vmem:[#allocation5 + $0x8] sm:$0xff]  ;;  %v1794_v28 = vld [vmem:[#allocation5] sm:$0xff] }
  0x14   :  { %1056 = vmatpush.bf16.msra.mxu0 %v1799_v8  ;;  %v1803_v25 = vld [vmem:[#allocation5 + $0x48] sm:$0xff]  ;;  %v1802_v29 = vld [vmem:[#allocation5 + $0x40] sm:$0xff]  ;;  %v1833_v32 = vld [vmem:[#allocation5 + $0x138] sm:$0xff] }
  0x15   :  { %1069 = vmatpush.bf16.msra.mxu1 %v1807_v9  ;;  %v1811_v26 = vld [vmem:[#allocation5 + $0x88] sm:$0xff]  ;;  %v46_v30 = vld [vmem:[#allocation2] sm:$0xff]  ;;  %v48_v33 = vld [vmem:[#allocation2 + $0x10] sm:$0xff] }
  0x16   :  { %1082 = vmatpush.bf16.msra.mxu2 %v1815_v10  ;;  %v1819_v27 = vld [vmem:[#allocation5 + $0xc8] sm:$0xff]  ;;  %v1810_v31 = vld [vmem:[#allocation5 + $0x80] sm:$0xff]  ;;  %v1841_v34 = vld [vmem:[#allocation5 + $0x178] sm:$0xff]  ;;  %v62_v38 = vpack.c.bf16 %v46_v30, %v46_v30  ;;  %v64_v40 = vpack.c.bf16 %v48_v33, %v48_v33 }
  0x17   :  { %1095 = vmatpush.bf16.msra.mxu3 %v1823_v11  ;;  %v1849_v35 = vld [vmem:[#allocation5 + $0x1b8] sm:$0xff]  ;;  %v47_v36 = vld [vmem:[#allocation2 + $0x8] sm:$0xff]  ;;  %v1818_v37 = vld [vmem:[#allocation5 + $0xc0] sm:$0xff] }
  0x18   :  { %1057 = vmatpush.bf16.msra.mxu0 %v1798_v12  ;;  %v1857_v39 = vld [vmem:[#allocation5 + $0x1f8] sm:$0xff]  ;;  %v1832_v42 = vld [vmem:[#allocation5 + $0x130] sm:$0xff]  ;;  %v63_v43 = vpack.c.bf16 %v47_v36, %v47_v36  ;;  %v1831_v48 = vld [vmem:[#allocation5 + $0x128] sm:$0xff] }
  0x19   :  { %1070 = vmatpush.bf16.msra.mxu1 %v1806_v13  ;;  %v49_v41 = vld [vmem:[#allocation2 + $0x18] sm:$0xff]  ;;  %v1840_v44 = vld [vmem:[#allocation5 + $0x170] sm:$0xff]  ;;  %v1839_v49 = vld [vmem:[#allocation5 + $0x168] sm:$0xff] }
  0x1a   :  { %1083 = vmatpush.bf16.msra.mxu2 %v1814_v14  ;;  %v1848_v45 = vld [vmem:[#allocation5 + $0x1b0] sm:$0xff]  ;;  %v65_v46 = vpack.c.bf16 %v49_v41, %v49_v41  ;;  %v1847_v50 = vld [vmem:[#allocation5 + $0x1a8] sm:$0xff]  ;;  %v1830_v52 = vld [vmem:[#allocation5 + $0x120] sm:$0xff] }
  0x1b   :  { %1096 = vmatpush.bf16.msra.mxu3 %v1822_v15  ;;  %v1856_v47 = vld [vmem:[#allocation5 + $0x1f0] sm:$0xff]  ;;  %v1855_v51 = vld [vmem:[#allocation5 + $0x1e8] sm:$0xff]  ;;  %v1838_v53 = vld [vmem:[#allocation5 + $0x160] sm:$0xff] }
  0x1c   :  { %1058 = vmatpush.bf16.msra.mxu0 %v1797_v16  ;;  %v1846_v54 = vld [vmem:[#allocation5 + $0x1a0] sm:$0xff]  ;;  %v1829_v56 = vld [vmem:[#allocation5 + $0x118] sm:$0xff]  ;;  %v1828_v60 = vld [vmem:[#allocation5 + $0x110] sm:$0xff] }
  0x1d   :  { %1071 = vmatpush.bf16.msra.mxu1 %v1805_v17  ;;  %v1854_v55 = vld [vmem:[#allocation5 + $0x1e0] sm:$0xff]  ;;  %v1837_v57 = vld [vmem:[#allocation5 + $0x158] sm:$0xff]  ;;  %v1836_v61 = vld [vmem:[#allocation5 + $0x150] sm:$0xff] }
  0x1e   :  { %1084 = vmatpush.bf16.msra.mxu2 %v1813_v18  ;;  %v1845_v58 = vld [vmem:[#allocation5 + $0x198] sm:$0xff]  ;;  %v1844_v62 = vld [vmem:[#allocation5 + $0x190] sm:$0xff]  ;;  %v1827_v0 = vld [vmem:[#allocation5 + $0x108] sm:$0xff] }
  0x1f   :  { %1097 = vmatpush.bf16.msra.mxu3 %v1821_v19  ;;  %v1853_v59 = vld [vmem:[#allocation5 + $0x1d8] sm:$0xff]  ;;  %v1852_v63 = vld [vmem:[#allocation5 + $0x1d0] sm:$0xff]  ;;  %v1835_v1 = vld [vmem:[#allocation5 + $0x148] sm:$0xff] }
  0x20   :  { %1059 = vmatpush.bf16.msra.mxu0 %v1796_v20  ;;  %v1843_v2 = vld [vmem:[#allocation5 + $0x188] sm:$0xff]  ;;  %v1826_v4 = vld [vmem:[#allocation5 + $0x100] sm:$0xff]  ;;  %v1865_v7 = vld [vmem:[#allocation5 + $0x238] sm:$0xff] }
  0x21   :  { %1072 = vmatpush.bf16.msra.mxu1 %v1804_v21  ;;  %v1851_v3 = vld [vmem:[#allocation5 + $0x1c8] sm:$0xff]  ;;  %v1834_v5 = vld [vmem:[#allocation5 + $0x140] sm:$0xff]  ;;  %v52_v8 = vld [vmem:[#allocation2 + $0x30] sm:$0xff] }
  0x22   :  { %1085 = vmatpush.bf16.msra.mxu2 %v1812_v22  ;;  %v1842_v6 = vld [vmem:[#allocation5 + $0x180] sm:$0xff]  ;;  %v1873_v9 = vld [vmem:[#allocation5 + $0x278] sm:$0xff]  ;;  %v51_v11 = vld [vmem:[#allocation2 + $0x28] sm:$0xff]  ;;  %v68_v15 = vpack.c.bf16 %v52_v8, %v52_v8 }
  0x23   :  { %1098 = vmatpush.bf16.msra.mxu3 %v1820_v23  ;;  %v50_v10 = vld [vmem:[#allocation2 + $0x20] sm:$0xff]  ;;  %v1881_v12 = vld [vmem:[#allocation5 + $0x2b8] sm:$0xff]  ;;  %v67_v18 = vpack.c.bf16 %v51_v11, %v51_v11  ;;  %v1864_v19 = vld [vmem:[#allocation5 + $0x230] sm:$0xff] }
  0x24   :  { %1060 = vmatpush.bf16.msra.mxu0 %v1795_v24  ;;  %v1850_v13 = vld [vmem:[#allocation5 + $0x1c0] sm:$0xff]  ;;  %v1889_v14 = vld [vmem:[#allocation5 + $0x2f8] sm:$0xff]  ;;  %v66_v17 = vpack.c.bf16 %v50_v10, %v50_v10  ;;  %v1872_v20 = vld [vmem:[#allocation5 + $0x270] sm:$0xff] }
  0x25   :  { %1073 = vmatpush.bf16.msra.mxu1 %v1803_v25  ;;  %v53_v16 = vld [vmem:[#allocation2 + $0x38] sm:$0xff]  ;;  %v1880_v21 = vld [vmem:[#allocation5 + $0x2b0] sm:$0xff]  ;;  %v1863_v24 = vld [vmem:[#allocation5 + $0x228] sm:$0xff] }
  0x26   :  { %1086 = vmatpush.bf16.msra.mxu2 %v1811_v26  ;;  %v69_v22 = vpack.c.bf16 %v53_v16, %v53_v16  ;;  %v1888_v23 = vld [vmem:[#allocation5 + $0x2f0] sm:$0xff]  ;;  %v1871_v25 = vld [vmem:[#allocation5 + $0x268] sm:$0xff]  ;;  %v1878_v30 = vld [vmem:[#allocation5 + $0x2a0] sm:$0xff] }
  0x27   :  { %1099 = vmatpush.bf16.msra.mxu3 %v1819_v27  ;;  %v1879_v26 = vld [vmem:[#allocation5 + $0x2a8] sm:$0xff]  ;;  %v1869_v33 = vld [vmem:[#allocation5 + $0x258] sm:$0xff]  ;;  %v1860_v36 = vld [vmem:[#allocation5 + $0x210] sm:$0xff] }
  0x28   :  { %1061 = vmatpush.bf16.msra.mxu0 %v1794_v28  ;;  %v1887_v27 = vld [vmem:[#allocation5 + $0x2e8] sm:$0xff]  ;;  %v1862_v28 = vld [vmem:[#allocation5 + $0x220] sm:$0xff]  ;;  %v61_v8 = vld [vmem:[#allocation2 + $0x78] sm:$0xff] }
  0x29   :  { %1074 = vmatpush.bf16.msra.mxu1 %v1802_v29  ;;  %v1870_v29 = vld [vmem:[#allocation5 + $0x260] sm:$0xff]  ;;  %v1867_v41 = vld [vmem:[#allocation5 + $0x248] sm:$0xff]  ;;  %v1900_v10 = vld [vmem:[#allocation5 + $0x350] sm:$0xff]  ;;  %v77_v11 = vpack.c.bf16 %v61_v8, %v61_v8 }
  0x2a   :  { %1087 = vmatpush.bf16.msra.mxu2 %v1810_v31  ;;  %v1886_v31 = vld [vmem:[#allocation5 + $0x2e0] sm:$0xff] }
  0x2b   :  { %1100 = vmatpush.bf16.msra.mxu3 %v1818_v37  ;;  %1062 = vmatmul.bf16.vlgmr.msra.gmra.mxu0 %v62_v38  ;;  %v1868_v37 = vld [vmem:[#allocation5 + $0x250] sm:$0xff]  ;;  %v1890_v16 = vld [vmem:[#allocation5 + $0x300] sm:$0xff] }
  0x2c   :  { %1106 = vmatpush.bf16.msrb.mxu0 %v1833_v32  ;;  %1075 = vmatmul.bf16.vlgmr.msra.gmra.mxu1 %v63_v43  ;;  %v1861_v32 = vld [vmem:[#allocation5 + $0x218] sm:$0xff]  ;;  %v1876_v38 = vld [vmem:[#allocation5 + $0x290] sm:$0xff]  ;;  %v1883_v43 = vld [vmem:[#allocation5 + $0x2c8] sm:$0xff] }
  0x2d   :  { %1119 = vmatpush.bf16.msrb.mxu1 %v1841_v34  ;;  %1088 = vmatmul.bf16.vlgmr.msra.gmra.mxu2 %v64_v40  ;;  %v1877_v34 = vld [vmem:[#allocation5 + $0x298] sm:$0xff]  ;;  %v1859_v40 = vld [vmem:[#allocation5 + $0x208] sm:$0xff] }
  0x2e   :  { %1132 = vmatpush.bf16.msrb.mxu2 %v1849_v35  ;;  %1101 = vmatmul.bf16.vlgmr.msra.gmra.mxu3 %v65_v46  ;;  %v1885_v35 = vld [vmem:[#allocation5 + $0x2d8] sm:$0xff]  ;;  %v1874_v46 = vld [vmem:[#allocation5 + $0x280] sm:$0xff] }
  0x2f   :  { %1145 = vmatpush.bf16.msrb.mxu3 %v1857_v39  ;;  %v1884_v39 = vld [vmem:[#allocation5 + $0x2d0] sm:$0xff] }
  0x30   :  { %1107 = vmatpush.bf16.msrb.mxu0 %v1832_v42  ;;  %v1875_v42 = vld [vmem:[#allocation5 + $0x288] sm:$0xff] }
  0x31   :  { %1120 = vmatpush.bf16.msrb.mxu1 %v1840_v44  ;;  %v1858_v44 = vld [vmem:[#allocation5 + $0x200] sm:$0xff] }
  0x32   :  { %1133 = vmatpush.bf16.msrb.mxu2 %v1848_v45  ;;  %v1866_v45 = vld [vmem:[#allocation5 + $0x240] sm:$0xff] }
  0x33   :  { %1146 = vmatpush.bf16.msrb.mxu3 %v1856_v47  ;;  %v54_v47 = vld [vmem:[#allocation2 + $0x40] sm:$0xff] }
  0x34   :  { %1108 = vmatpush.bf16.msrb.mxu0 %v1831_v48  ;;  %v1897_v48 = vld [vmem:[#allocation5 + $0x338] sm:$0xff] }
  0x35   :  { %1121 = vmatpush.bf16.msrb.mxu1 %v1839_v49  ;;  %v56_v49 = vld [vmem:[#allocation2 + $0x50] sm:$0xff] }
  0x36   :  { %1134 = vmatpush.bf16.msrb.mxu2 %v1847_v50  ;;  %v55_v50 = vld [vmem:[#allocation2 + $0x48] sm:$0xff] }
  0x37   :  { %1147 = vmatpush.bf16.msrb.mxu3 %v1855_v51  ;;  %v1905_v51 = vld [vmem:[#allocation5 + $0x378] sm:$0xff] }
  0x38   :  { %1109 = vmatpush.bf16.msrb.mxu0 %v1830_v52  ;;  %v1913_v52 = vld [vmem:[#allocation5 + $0x3b8] sm:$0xff] }
  0x39   :  { %1122 = vmatpush.bf16.msrb.mxu1 %v1838_v53  ;;  %v1882_v53 = vld [vmem:[#allocation5 + $0x2c0] sm:$0xff] }
  0x3a   :  { %1135 = vmatpush.bf16.msrb.mxu2 %v1846_v54  ;;  %v70_v54 = vpack.c.bf16 %v54_v47, %v54_v47 }
  0x3b   :  { %1148 = vmatpush.bf16.msrb.mxu3 %v1854_v55  ;;  %v57_v55 = vld [vmem:[#allocation2 + $0x58] sm:$0xff] }
  0x3c   :  { %1110 = vmatpush.bf16.msrb.mxu0 %v1829_v56  ;;  %v72_v56 = vpack.c.bf16 %v56_v49, %v56_v49 }
  0x3d   :  { %1123 = vmatpush.bf16.msrb.mxu1 %v1837_v57  ;;  %v71_v57 = vpack.c.bf16 %v55_v50, %v55_v50 }
  0x3e   :  { %1136 = vmatpush.bf16.msrb.mxu2 %v1845_v58  ;;  %v1896_v58 = vld [vmem:[#allocation5 + $0x330] sm:$0xff] }
  0x3f   :  { %1149 = vmatpush.bf16.msrb.mxu3 %v1853_v59  ;;  %v1914_v59 = vld [vmem:[#allocation5 + $0x3c0] sm:$0xff] }
  0x40   :  { %1111 = vmatpush.bf16.msrb.mxu0 %v1828_v60  ;;  %v73_v60 = vpack.c.bf16 %v57_v55, %v57_v55 }
  0x41   :  { %1124 = vmatpush.bf16.msrb.mxu1 %v1836_v61  ;;  %v1904_v61 = vld [vmem:[#allocation5 + $0x370] sm:$0xff] }
  0x42   :  { %1137 = vmatpush.bf16.msrb.mxu2 %v1844_v62  ;;  %v1912_v62 = vld [vmem:[#allocation5 + $0x3b0] sm:$0xff] }
  0x43   :  { %1150 = vmatpush.bf16.msrb.mxu3 %v1852_v63  ;;  %v1895_v63 = vld [vmem:[#allocation5 + $0x328] sm:$0xff] }
  0x44   :  { %1112 = vmatpush.bf16.msrb.mxu0 %v1827_v0  ;;  %v1903_v0 = vld [vmem:[#allocation5 + $0x368] sm:$0xff] }
  0x45   :  { %1125 = vmatpush.bf16.msrb.mxu1 %v1835_v1  ;;  %v1911_v1 = vld [vmem:[#allocation5 + $0x3a8] sm:$0xff] }
  0x46   :  { %1138 = vmatpush.bf16.msrb.mxu2 %v1843_v2  ;;  %v1894_v2 = vld [vmem:[#allocation5 + $0x320] sm:$0xff] }
  0x47   :  { %1151 = vmatpush.bf16.msrb.mxu3 %v1851_v3  ;;  %v1902_v3 = vld [vmem:[#allocation5 + $0x360] sm:$0xff] }
  0x48   :  { %1113 = vmatpush.bf16.msrb.mxu0 %v1826_v4  ;;  %v1910_v4 = vld [vmem:[#allocation5 + $0x3a0] sm:$0xff] }
  0x49   :  { %1126 = vmatpush.bf16.msrb.mxu1 %v1834_v5  ;;  %v1893_v5 = vld [vmem:[#allocation5 + $0x318] sm:$0xff] }
  0x4a   :  { %1139 = vmatpush.bf16.msrb.mxu2 %v1842_v6  ;;  %v1901_v6 = vld [vmem:[#allocation5 + $0x358] sm:$0xff] }
  0x4b   :  { %1152 = vmatpush.bf16.msrb.mxu3 %v1850_v13  ;;  %1114 = vmatmul.bf16.vlgmr.msrb.gmra.mxu0 %v66_v17  ;;  %v1891_v13 = vld [vmem:[#allocation5 + $0x308] sm:$0xff]  ;;  %v58_v17 = vld [vmem:[#allocation2 + $0x60] sm:$0xff] }
  0x4c   :  { %1158 = vmatpush.bf16.msra.mxu0 %v1865_v7  ;;  %1127 = vmatmul.bf16.vlgmr.msrb.gmra.mxu1 %v67_v18  ;;  %v1909_v7 = vld [vmem:[#allocation5 + $0x398] sm:$0xff]  ;;  %v1898_v18 = vld [vmem:[#allocation5 + $0x340] sm:$0xff] }
  0x4d   :  { %1171 = vmatpush.bf16.msra.mxu1 %v1873_v9  ;;  %1140 = vmatmul.bf16.vlgmr.msrb.gmra.mxu2 %v68_v15  ;;  %v1892_v9 = vld [vmem:[#allocation5 + $0x310] sm:$0xff]  ;;  %v1907_v15 = vld [vmem:[#allocation5 + $0x388] sm:$0xff] }
  0x4e   :  { %1184 = vmatpush.bf16.msra.mxu2 %v1881_v12  ;;  %1153 = vmatmul.bf16.vlgmr.msrb.gmra.mxu3 %v69_v22  ;;  %v1908_v12 = vld [vmem:[#allocation5 + $0x390] sm:$0xff]  ;;  %v74_v22 = vpack.c.bf16 %v58_v17, %v58_v17 }
  0x4f   :  { %1197 = vmatpush.bf16.msra.mxu3 %v1889_v14  ;;  %v1899_v14 = vld [vmem:[#allocation5 + $0x348] sm:$0xff] }
  0x50   :  { %1159 = vmatpush.bf16.msra.mxu0 %v1864_v19  ;;  %v59_v19 = vld [vmem:[#allocation2 + $0x68] sm:$0xff] }
  0x51   :  { %1172 = vmatpush.bf16.msra.mxu1 %v1872_v20  ;;  %v1906_v20 = vld [vmem:[#allocation5 + $0x380] sm:$0xff] }
  0x52   :  { %1185 = vmatpush.bf16.msra.mxu2 %v1880_v21  ;;  %v60_v21 = vld [vmem:[#allocation2 + $0x70] sm:$0xff] }
  0x53   :  { %1198 = vmatpush.bf16.msra.mxu3 %v1888_v23  ;;  %v75_v23 = vpack.c.bf16 %v59_v19, %v59_v19 }
  0x54   :  { %1160 = vmatpush.bf16.msra.mxu0 %v1863_v24  ;;  %v76_v24 = vpack.c.bf16 %v60_v21, %v60_v21 }
  0x55   :  { %1173 = vmatpush.bf16.msra.mxu1 %v1871_v25  ;;  %v1920_v25 = vld [vmem:[%s2042_s2] ss:$0 sm:$0xff]  ;;  %s2007_s2 = smov [#allocation7]  }
  0x56   :  { %1186 = vmatpush.bf16.msra.mxu2 %v1879_v26  ;;  %s1295_s24 = sshll.u32 %s2007_s2, 4  ;;  %s1296_s24 = int_to_ptr.vmem [resolvable:$true] %s1295_s24 }
  0x57   :  { %1199 = vmatpush.bf16.msra.mxu3 %v1887_v27 }
  0x58   :  { %1161 = vmatpush.bf16.msra.mxu0 %v1862_v28 }
  0x59   :  { %1174 = vmatpush.bf16.msra.mxu1 %v1870_v29 }
  0x5a   :  { %1187 = vmatpush.bf16.msra.mxu2 %v1878_v30 }
  0x5b   :  { %1200 = vmatpush.bf16.msra.mxu3 %v1886_v31 }
  0x5c   :  { %1162 = vmatpush.bf16.msra.mxu0 %v1861_v32 }
  0x5d   :  { %1175 = vmatpush.bf16.msra.mxu1 %v1869_v33 }
  0x5e   :  { %1188 = vmatpush.bf16.msra.mxu2 %v1877_v34 }
  0x5f   :  { %1201 = vmatpush.bf16.msra.mxu3 %v1885_v35 }
  0x60   :  { %1163 = vmatpush.bf16.msra.mxu0 %v1860_v36 }
  0x61   :  { %1176 = vmatpush.bf16.msra.mxu1 %v1868_v37 }
  0x62   :  { %1189 = vmatpush.bf16.msra.mxu2 %v1876_v38 }
  0x63   :  { %1202 = vmatpush.bf16.msra.mxu3 %v1884_v39 }
  0x64   :  { %1164 = vmatpush.bf16.msra.mxu0 %v1859_v40 }
  0x65   :  { %1177 = vmatpush.bf16.msra.mxu1 %v1867_v41 }
  0x66   :  { %1190 = vmatpush.bf16.msra.mxu2 %v1875_v42 }
  0x67   :  { %1203 = vmatpush.bf16.msra.mxu3 %v1883_v43 }
  0x68   :  { %1165 = vmatpush.bf16.msra.mxu0 %v1858_v44 }
  0x69   :  { %1178 = vmatpush.bf16.msra.mxu1 %v1866_v45 }
  0x6a   :  { %1191 = vmatpush.bf16.msra.mxu2 %v1874_v46 }
  0x6b   :  { %1204 = vmatpush.bf16.msra.mxu3 %v1882_v53  ;;  %1166 = vmatmul.bf16.vlgmr.msra.gmra.mxu0 %v70_v54 }
  0x6c   :  { %1210 = vmatpush.bf16.msrb.mxu0 %v1897_v48  ;;  %1179 = vmatmul.bf16.vlgmr.msra.gmra.mxu1 %v71_v57 }
  0x6d   :  { %1223 = vmatpush.bf16.msrb.mxu1 %v1905_v51  ;;  %1192 = vmatmul.bf16.vlgmr.msra.gmra.mxu2 %v72_v56 }
  0x6e   :  { %1236 = vmatpush.bf16.msrb.mxu2 %v1913_v52  ;;  %1205 = vmatmul.bf16.vlgmr.msra.gmra.mxu3 %v73_v60 }
  0x6f   :  { %1256 = vmatpush.bf16.msrb.mxu3 %v1914_v59 }
  0x70   :  { %1211 = vmatpush.bf16.msrb.mxu0 %v1896_v58 }
  0x71   :  { %1224 = vmatpush.bf16.msrb.mxu1 %v1904_v61 }
  0x72   :  { %1237 = vmatpush.bf16.msrb.mxu2 %v1912_v62 }
  0x74   :  { %1212 = vmatpush.bf16.msrb.mxu0 %v1895_v63 }
  0x75   :  { %1225 = vmatpush.bf16.msrb.mxu1 %v1903_v0 }
  0x76   :  { %1238 = vmatpush.bf16.msrb.mxu2 %v1911_v1 }
  0x78   :  { %1213 = vmatpush.bf16.msrb.mxu0 %v1894_v2 }
  0x79   :  { %1226 = vmatpush.bf16.msrb.mxu1 %v1902_v3 }
  0x7a   :  { %1239 = vmatpush.bf16.msrb.mxu2 %v1910_v4 }
  0x7c   :  { %1214 = vmatpush.bf16.msrb.mxu0 %v1893_v5 }
  0x7d   :  { %1227 = vmatpush.bf16.msrb.mxu1 %v1901_v6 }
  0x7e   :  { %1240 = vmatpush.bf16.msrb.mxu2 %v1909_v7  ;;  %1792 = vmatmul.msk.bf16.vlgmr.msrb.gmra.mxu3 %vm1050_vm0, %v77_v11 }
  0x80   :  { %1215 = vmatpush.bf16.msrb.mxu0 %v1892_v9 }
  0x81   :  { %1228 = vmatpush.bf16.msrb.mxu1 %v1900_v10 }
  0x82   :  { %1241 = vmatpush.bf16.msrb.mxu2 %v1908_v12 }
  0x84   :  { %1216 = vmatpush.bf16.msrb.mxu0 %v1891_v13  ;;  %v1262_v13 = vlaneseq }
  0x85   :  { %1229 = vmatpush.bf16.msrb.mxu1 %v1899_v14 }
  0x86   :  { %1242 = vmatpush.bf16.msrb.mxu2 %v1907_v15  ;;  %v1263_v15 = vand.u32 127, %v1262_v13 }
  0x88   :  { %1217 = vmatpush.bf16.msrb.mxu0 %v1890_v16  ;;  %vm1264_vm1 = vcmp.ge.s32.totalorder %v1263_v15, 3  ;;  %vm1265_vm2 = vcmp.lt.s32.totalorder %v1263_v15, 26 }
  0x89   :  { %1230 = vmatpush.bf16.msrb.mxu1 %v1898_v18  ;;  %vm1266_vm4 = vmand %vm1264_vm1, %vm1265_vm2 }
  0x8a   :  { %1243 = vmatpush.bf16.msrb.mxu2 %v1906_v20 }
  0x8b   :  { %1218 = vmatmul.bf16.vlgmr.msrb.gmra.mxu0 %v74_v22 }
  0x8c   :  { %1231 = vmatmul.bf16.vlgmr.msrb.gmra.mxu1 %v75_v23 }
  0x8d   :  { %1244 = vmatmul.bf16.vlgmr.msrb.gmra.mxu2 %v76_v24 }
  0xa8   :  { %v1063_v26 = vpop.f32.mrf.mxu0 }
  0xa9   :  { %v1064_v27 = vadd.f32 %v1920_v25, %v1063_v26  ;;  %v1076_v28 = vpop.f32.mrf.mxu1 }
  0xab   :  { %v1077_v29 = vadd.f32 %v1076_v28, %v1064_v27 }
  0xb0   :  { %v1089_v30 = vpop.f32.mrf.mxu2  ;;  %v1065_v32 = vpop.f32.mrf.mxu0 }
  0xb1   :  { %v1090_v31 = vadd.f32 %v1089_v30, %v1077_v29  ;;  %v1102_v33 = vpop.f32.mrf.mxu3  ;;  %v1078_v34 = vpop.f32.mrf.mxu1 }
  0xb3   :  { %v1103_v35 = vadd.f32 %v1102_v33, %v1090_v31 }
  0xb8   :  { %v1091_v36 = vpop.f32.mrf.mxu2 }
  0xb9   :  { %v1104_v37 = vpop.f32.mrf.mxu3 }
  0xc8   :  { %v1115_v38 = vpop.f32.mrf.mxu0 }
  0xc9   :  { %v1128_v39 = vpop.f32.mrf.mxu1  ;;  %v1116_v48 = vadd.f32 %v1115_v38, %v1103_v35 }
  0xcb   :  { %v1129_v53 = vadd.f32 %v1128_v39, %v1116_v48 }
  0xd0   :  { %v1141_v40 = vpop.f32.mrf.mxu2  ;;  %v1117_v42 = vpop.f32.mrf.mxu0 }
  0xd1   :  { %v1154_v41 = vpop.f32.mrf.mxu3  ;;  %v1130_v43 = vpop.f32.mrf.mxu1  ;;  %v1142_v54 = vadd.f32 %v1141_v40, %v1129_v53 }
  0xd3   :  { %v1155_v57 = vadd.f32 %v1154_v41, %v1142_v54 }
  0xd8   :  { %v1143_v44 = vpop.f32.mrf.mxu2 }
  0xd9   :  { %v1156_v45 = vpop.f32.mrf.mxu3 }
  0xe8   :  { %v1167_v46 = vpop.f32.mrf.mxu0 }
  0xe9   :  { %v1180_v47 = vpop.f32.mrf.mxu1  ;;  %v1168_v58 = vadd.f32 %v1167_v46, %v1155_v57 }
  0xeb   :  { %v1181_v59 = vadd.f32 %v1180_v47, %v1168_v58 }
  0xf0   :  { %v1193_v49 = vpop.f32.mrf.mxu2  ;;  %v1169_v50 = vpop.f32.mrf.mxu0 }
  0xf1   :  { %v1206_v51 = vpop.f32.mrf.mxu3  ;;  %v1182_v52 = vpop.f32.mrf.mxu1  ;;  %v1194_v61 = vadd.f32 %v1193_v49, %v1181_v59 }
  0xf3   :  { %v1207_v63 = vadd.f32 %v1206_v51, %v1194_v61 }
  0xf8   :  { %v1195_v55 = vpop.f32.mrf.mxu2 }
  0xf9   :  { %v1208_v56 = vpop.f32.mrf.mxu3 }
 0x101   :  { %v1258_v60 = vpop.f32.mrf.mxu3 }
 0x108   :  { %v1219_v62 = vpop.f32.mrf.mxu0 }
 0x109   :  { %v1232_v0 = vpop.f32.mrf.mxu1  ;;  %v1220_v1 = vadd.f32 %v1219_v62, %v1207_v63  ;;  %v1260_v2 = vpop.f32.mrf.mxu3 }
 0x10b   :  { %v1233_v3 = vadd.f32 %v1232_v0, %v1220_v1 }
 0x110   :  { %v1245_v4 = vpop.f32.mrf.mxu2  ;;  %v1221_v5 = vpop.f32.mrf.mxu0 }
 0x111   :  { %v1246_v6 = vadd.f32 %v1245_v4, %v1233_v3  ;;  %v1234_v7 = vpop.f32.mrf.mxu1 }
 0x113   :  { %v1259_v8 = vadd.f32 %v1258_v60, %v1246_v6 }
 0x115   :  { %v1793_v9 = vmul.f32 -1.442695, %v1259_v8 }
 0x117   :  { %1921 = vpow2.f32 %v1793_v9 }
 0x118   :  { %v1247_v10 = vpop.f32.mrf.mxu2 }
 0x11d   :  { %v1922_v11 = vpop.eup %1921 }
 0x11e   :  { %v1270_v12 = vadd.f32 1.0, %v1922_v11 }
 0x120   :  { %1923 = vrcp.f32 %v1270_v12  ;;  %v1282_v18 = vand.u32 2147483648, %v1270_v12  ;;  %v1280_v20 = vand.u32 2147483647, %v1270_v12  ;;  %vm1276_vm5 = vweird.f32 %v1270_v12 }
 0x122   :  { %v1283_v22 = vor.u32 1.1754944e-38, %v1282_v18  ;;  %vm1281_vm7 = vcmp.eq.f32.partialorder %v1280_v20, 8.507059e+37 }
 0x126   :  { %v1924_v14 = vpop.eup %1923 }
 0x127   :  { %v1272_v16 = vmul.f32 %v1924_v14, %v1270_v12  ;;  %vm1277_vm3 = vweird.f32 %v1924_v14 }
 0x128   :  { %vm1278_vm6 = vmor %vm1276_vm5, %vm1277_vm3 }
 0x129   :  { %v1273_v17 = vsub.f32 1.0, %v1272_v16 }
 0x12b   :  { %v1274_v19 = vmul.f32 %v1924_v14, %v1273_v17 }
 0x12d   :  { %v1275_v21 = vadd.f32 %v1924_v14, %v1274_v19 }
 0x12f   :  { %v1279_v23 = vsel %vm1278_vm6, %v1924_v14, %v1275_v21 }
 0x130   :  { %v1284_v24 = vsel %vm1281_vm7, %v1283_v22, %v1279_v23 }
 0x131   :  { %v1288_v25 = vsel %vm1266_vm4, %v1284_v24, %v1259_v8 }
 0x132   :  { %1289 = vst [vmem:[#allocation7] sm:$0xff] %v1288_v25 }
 0x133   :  { %1300 = dma.vmem_to_hbm [thread:$0]  %s1296_s24, 128, %s1298_s27, [#allocation4]  }
 0x134   :  { %2001 = dma.done.wait [#allocation4], 128  }
 0x135   :  { %2002 = vsyncadd [#allocation4], 4294967168 }
 0x136   :  { %1305 = vsyncpa [#allocation3], 1 }
 0x137   :  { %1306 = vsyncpa [#allocation6], 1 }
 0x138   :  { %1307 = vsyncpa [#allocation4], 1 }

</bundles_post_ra>
